<compile_context>
chip_gen: v7x
topology: tpu7x:2x2x1
jax: 0.10.0
libtpu: 0.0.40
codegen_flags: <defaults>
</compile_context>

<pallas_src>
import functools

import jax
import jax.numpy as jnp
import numpy as np
from jax.experimental import pallas as pl
from jax.experimental.pallas import tpu as pltpu


# ------------------------------------------------------------------ packed-bias layout
# (offset, length) for each layer's bias inside the single (1, 1408) slab.
# Offsets are multiples of 128 so every in-kernel slice is lane-aligned.
_B_A = (0, 320)      # fused sub-encoder layer 1 (magn 64 | wifi 128 | ibeacon 128)
_B_B = (384, 160)    # fused sub-encoder layer 2 (magn 32 | wifi 64  | ibeacon 64)
_B_E1 = (640, 128)   # main encoder Linear(160,128)  (BN folded)
_B_E2 = (768, 64)    # main encoder Linear(128,64)   (BN folded)
_B_E3 = (896, 32)    # main encoder Linear(64,32)
_B_D1 = (1024, 64)   # decoder Linear(32,64)         (BN folded)
_B_D2 = (1152, 128)  # decoder Linear(64,128)        (BN folded)
_B_D3 = (1280, 2)    # decoder Linear(128,2)
_BIAS_TOTAL = 1408


# ------------------------------------------------------------------------------ kernel
def _dlnetwork_kernel(x_ref, wa_ref, wb_ref, we1_ref, we2_ref, we3_ref,
                      wd1_ref, wd2_ref, wd3_ref, bias_ref, out_ref):
    def mm(h, w_ref):
        # MXU matmul: bf16 operands (weights stored bf16), f32 accumulation.
        return jnp.dot(h.astype(w_ref.dtype), w_ref[...],
                       preferred_element_type=jnp.float32)

    def bias(slot):
        off, n = slot
        return bias_ref[:, off:off + n]          # (1, n) f32, lane-aligned static slice

    x = x_ref[...]                                                 # (TB, 6+W+I) f32

    # fused sub-encoders: Linear+BN (folded) -> Dropout(id) -> ReLU -> Linear
    h = jnp.maximum(mm(x, wa_ref) + bias(_B_A), 0.0)               # (TB, 320)
    h = mm(h, wb_ref) + bias(_B_B)                                 # (TB, 160) == concat

    # main encoder
    h = jnp.maximum(mm(h, we1_ref) + bias(_B_E1), 0.0)             # (TB, 128)
    h = jnp.maximum(mm(h, we2_ref) + bias(_B_E2), 0.0)             # (TB, 64)
    h = mm(h, we3_ref) + bias(_B_E3)                               # (TB, 32)

    # decoder
    h = jnp.tanh(mm(h, wd1_ref) + bias(_B_D1))                     # (TB, 64)
    h = jnp.tanh(mm(h, wd2_ref) + bias(_B_D2))                     # (TB, 128)
    out_ref[...] = mm(h, wd3_ref) + bias(_B_D3)                    # (TB, 2)


# ------------------------------------------------------------------------------ params
def _linear_params(key, fan_in, fan_out):
    """PyTorch default Linear init (uniform +-1/sqrt(fan_in)), stored (fan_in, fan_out)."""
    k_w, k_b = jax.random.split(key)
    bound = 1.0 / np.sqrt(fan_in)
    w = jax.random.uniform(k_w, (fan_in, fan_out), jnp.float32, -bound, bound)
    b = jax.random.uniform(k_b, (fan_out,), jnp.float32, -bound, bound)
    return w, b


def _bn_scale_shift(dim, eps=1e-5):
    """Eval-mode BatchNorm1d with fresh running stats: gamma=1, beta=0, mean=0, var=1."""
    gamma = jnp.ones((dim,), jnp.float32)
    beta = jnp.zeros((dim,), jnp.float32)
    mean = jnp.zeros((dim,), jnp.float32)
    var = jnp.ones((dim,), jnp.float32)
    scale = gamma * jax.lax.rsqrt(var + eps)
    return scale, beta - mean * scale


def _fold_bn(w, b, scale, shift):
    """Fold eval-mode BN (y*s + t) into the preceding Linear: W' = W*s, b' = b*s + t."""
    return w * scale[None, :], b * scale + shift


def make_raw_params(key, wifi_dim, ibeacon_dim):
    """Per-layer parameters mirroring the PyTorch module structure (all f32)."""
    keys = iter(jax.random.split(key, 16))
    p = {}
    # sub-encoders: Linear(in, 2h), BN, Dropout, ReLU, Linear(2h, h)
    p["magn_w1"], p["magn_b1"] = _linear_params(next(keys), 4, 64)
    p["magn_bn1"] = _bn_scale_shift(64)
    p["magn_w2"], p["magn_b2"] = _linear_params(next(keys), 64, 32)
    p["wifi_w1"], p["wifi_b1"] = _linear_params(next(keys), wifi_dim + 1, 128)
    p["wifi_bn1"] = _bn_scale_shift(128)
    p["wifi_w2"], p["wifi_b2"] = _linear_params(next(keys), 128, 64)
    p["ib_w1"], p["ib_b1"] = _linear_params(next(keys), ibeacon_dim + 1, 128)
    p["ib_bn1"] = _bn_scale_shift(128)
    p["ib_w2"], p["ib_b2"] = _linear_params(next(keys), 128, 64)
    # main encoder
    p["enc_w1"], p["enc_b1"] = _linear_params(next(keys), 160, 128)
    p["enc_bn1"] = _bn_scale_shift(128)
    p["enc_w2"], p["enc_b2"] = _linear_params(next(keys), 128, 64)
    p["enc_bn2"] = _bn_scale_shift(64)
    p["enc_w3"], p["enc_b3"] = _linear_params(next(keys), 64, 32)
    # decoder
    p["dec_w1"], p["dec_b1"] = _linear_params(next(keys), 32, 64)
    p["dec_bn1"] = _bn_scale_shift(64)
    p["dec_w2"], p["dec_b2"] = _linear_params(next(keys), 64, 128)
    p["dec_bn2"] = _bn_scale_shift(128)
    p["dec_w3"], p["dec_b3"] = _linear_params(next(keys), 128, 2)
    return p


def consolidate(raw, wifi_dim, ibeacon_dim):
    """BN-fold + fuse the sub-encoders into block matmuls + pack all biases (f32)."""
    W, I = wifi_dim, ibeacon_dim
    d_in = 6 + W + I

    # stage A: all three sub-encoder first Linears (+BN folds) on the raw x columns.
    mw1, mb1 = _fold_bn(raw["magn_w1"], raw["magn_b1"], *raw["magn_bn1"])
    ww1, wb1 = _fold_bn(raw["wifi_w1"], raw["wifi_b1"], *raw["wifi_bn1"])
    iw1, ib1 = _fold_bn(raw["ib_w1"], raw["ib_b1"], *raw["ib_bn1"])
    wa = jnp.zeros((d_in, 320), jnp.float32)
    wa = wa.at[0:4, 0:64].set(mw1)                      # magn rows x[:, :4]
    wa = wa.at[4:5, 64:192].set(ww1[0:1])               # wifi scalar x[:, 4]
    wa = wa.at[6:6 + W, 64:192].set(ww1[1:])            # wifi vector x[:, 6:6+W]
    wa = wa.at[5:6, 192:320].set(iw1[0:1])              # ibeacon scalar x[:, 5]
    wa = wa.at[6 + W:6 + W + I, 192:320].set(iw1[1:])   # ibeacon vector
    ba = jnp.concatenate([mb1, wb1, ib1])               # (320,)

    # stage B: block-diagonal second Linears; output == concat([m_out, w_out, i_out]).
    wb_ = jnp.zeros((320, 160), jnp.float32)
    wb_ = wb_.at[0:64, 0:32].set(raw["magn_w2"])
    wb_ = wb_.at[64:192, 32:96].set(raw["wifi_w2"])
    wb_ = wb_.at[192:320, 96:160].set(raw["ib_w2"])
    bb = jnp.concatenate([raw["magn_b2"], raw["wifi_b2"], raw["ib_b2"]])   # (160,)

    # main encoder (+BN folds on L1, L2) and decoder (+BN folds on L1, L2).
    we1, be1 = _fold_bn(raw["enc_w1"], raw["enc_b1"], *raw["enc_bn1"])
    we2, be2 = _fold_bn(raw["enc_w2"], raw["enc_b2"], *raw["enc_bn2"])
    we3, be3 = raw["enc_w3"], raw["enc_b3"]
    wd1, bd1 = _fold_bn(raw["dec_w1"], raw["dec_b1"], *raw["dec_bn1"])
    wd2, bd2 = _fold_bn(raw["dec_w2"], raw["dec_b2"], *raw["dec_bn2"])
    wd3, bd3 = raw["dec_w3"], raw["dec_b3"]

    weights = [wa, wb_, we1, we2, we3, wd1, wd2, wd3]

    # single packed bias slab, 128-lane-aligned slots.
    bias = jnp.zeros((1, _BIAS_TOTAL), jnp.float32)
    slots = [_B_A, _B_B, _B_E1, _B_E2, _B_E3, _B_D1, _B_D2, _B_D3]
    vecs = [ba, bb, be1, be2, be3, bd1, bd2, bd3]
    for (off, n), v in zip(slots, vecs):
        assert v.shape[0] == n
        bias = bias.at[0, off:off + n].set(v)
    return weights, bias


# ----------------------------------------------------------------------------- wrapper
def _round_up(x, m):
    return (x + m - 1) // m * m


@functools.partial(jax.jit, static_argnames=("block_batch",))
def dlnetwork_forward(x, weights, bias_packed, *, block_batch=512):
    """x: (B, 6 + wifi_dim + ibeacon_dim) f32 -> (B, 2) f32."""
    batch, d_in = x.shape
    tb = min(block_batch, _round_up(batch, 8))          # batch tile (multiple of 8)
    padded = _round_up(batch, tb)
    if padded != batch:
        x = jnp.pad(x, ((0, padded - batch), (0, 0)))   # pad rows are sliced off below

    grid = (padded // tb,)
    in_specs = [pl.BlockSpec((tb, d_in), lambda i: (i, 0))]          # batch-tiled input
    in_specs += [pl.BlockSpec(w.shape, lambda i: (0, 0))             # weights: VMEM-resident
                 for w in weights]
    in_specs += [pl.BlockSpec(bias_packed.shape, lambda i: (0, 0))]  # packed biases

    out = pl.pallas_call(
        _dlnetwork_kernel,
        out_shape=jax.ShapeDtypeStruct((padded, 2), jnp.float32),
        grid=grid,
        in_specs=in_specs,
        out_specs=pl.BlockSpec((tb, 2), lambda i: (i, 0)),
        compiler_params=pltpu.CompilerParams(
            dimension_semantics=("parallel",)),          # v7x: shard batch over 2 TCs
    )(x, *weights, bias_packed)
    return out[:batch]


# -------------------------------------------------------------------------- references
def _dotf(a, b):
    return jnp.dot(a, b, preferred_element_type=jnp.float32,
                   precision=jax.lax.Precision.HIGHEST)


def reference_naive(x, raw, wifi_dim, ibeacon_dim):
    """Faithful per-layer eval-mode forward of the PyTorch module (f32 weights)."""
    W, I = wifi_dim, ibeacon_dim

    def bn(h, ss):
        scale, shift = ss
        return h * scale + shift

    def sub(xin, w1, b1, bn1, w2, b2):
        h = jnp.maximum(bn(_dotf(xin, w1) + b1, bn1), 0.0)   # Linear, BN, Drop(id), ReLU
        return _dotf(h, w2) + b2

    magn = x[:, :4]
    wifi_in = jnp.concatenate([x[:, 4:5], x[:, 6:6 + W]], axis=1)
    ib_in = jnp.concatenate([x[:, 5:6], x[:, 6 + W:6 + W + I]], axis=1)
    m = sub(magn, raw["magn_w1"], raw["magn_b1"], raw["magn_bn1"],
            raw["magn_w2"], raw["magn_b2"])
    w = sub(wifi_in, raw["wifi_w1"], raw["wifi_b1"], raw["wifi_bn1"],
            raw["wifi_w2"], raw["wifi_b2"])
    i = sub(ib_in, raw["ib_w1"], raw["ib_b1"], raw["ib_bn1"],
            raw["ib_w2"], raw["ib_b2"])
    feat = jnp.concatenate([m, w, i], axis=1)
    h = jnp.maximum(bn(_dotf(feat, raw["enc_w1"]) + raw["enc_b1"], raw["enc_bn1"]), 0.0)
    h = jnp.maximum(bn(_dotf(h, raw["enc_w2"]) + raw["enc_b2"], raw["enc_bn2"]), 0.0)
    enc = _dotf(h, raw["enc_w3"]) + raw["enc_b3"]
    h = jnp.tanh(bn(_dotf(enc, raw["dec_w1"]) + raw["dec_b1"], raw["dec_bn1"]))
    h = jnp.tanh(bn(_dotf(h, raw["dec_w2"]) + raw["dec_b2"], raw["dec_bn2"]))
    return _dotf(h, raw["dec_w3"]) + raw["dec_b3"]


def reference_consolidated(x, weights, bias, compute_dtype):
    """Same math the kernel does (consolidated weights), in plain JAX."""
    def mm(h, w):
        return jnp.dot(h.astype(compute_dtype), w.astype(compute_dtype),
                       preferred_element_type=jnp.float32,
                       precision=jax.lax.Precision.HIGHEST)

    def b(slot):
        off, n = slot
        return bias[:, off:off + n]

    wa, wb_, we1, we2, we3, wd1, wd2, wd3 = weights
    h = jnp.maximum(mm(x, wa) + b(_B_A), 0.0)
    h = mm(h, wb_) + b(_B_B)
    h = jnp.maximum(mm(h, we1) + b(_B_E1), 0.0)
    h = jnp.maximum(mm(h, we2) + b(_B_E2), 0.0)
    h = mm(h, we3) + b(_B_E3)
    h = jnp.tanh(mm(h, wd1) + b(_B_D1))
    h = jnp.tanh(mm(h, wd2) + b(_B_D2))
    return mm(h, wd3) + b(_B_D3)


# -------------------------------------------------------------------------------- main
if __name__ == "__main__":
    WIFI_DIM = 16
    IBEACON_DIM = 8
    BATCH = 8
    IN_DIM = 6 + WIFI_DIM + IBEACON_DIM   # 30

    key = jax.random.PRNGKey(0)
    k_x, k_p = jax.random.split(key)
    x = jax.random.normal(k_x, (BATCH, IN_DIM), jnp.float32)

    raw = make_raw_params(k_p, WIFI_DIM, IBEACON_DIM)
    weights_f32, bias_packed = consolidate(raw, WIFI_DIM, IBEACON_DIM)
    weights_bf16 = [w.astype(jnp.bfloat16) for w in weights_f32]     # MXU-native storage

    out = dlnetwork_forward(x, weights_bf16, bias_packed)
    out = jax.block_until_ready(out)
    assert out.shape == (BATCH, 2)

    # 1) BN folding + block-matmul consolidation is mathematically exact (f32 vs f32).
    ref_naive = reference_naive(x, raw, WIFI_DIM, IBEACON_DIM)
    ref_cons_f32 = reference_consolidated(x, weights_f32, bias_packed, jnp.float32)
    np.testing.assert_allclose(np.asarray(ref_cons_f32), np.asarray(ref_naive),
                               rtol=1e-4, atol=1e-4)

    # 2) Kernel matches the same bf16-weight / f32-accumulate math in plain JAX.
    ref_cons_bf16 = reference_consolidated(x, weights_bf16, bias_packed, jnp.bfloat16)
    np.testing.assert_allclose(np.asarray(out), np.asarray(ref_cons_bf16),
                               rtol=2e-3, atol=2e-3)

    # 3) Sanity: bf16-weight kernel stays close to the full-f32 module output.
    np.testing.assert_allclose(np.asarray(out), np.asarray(ref_naive),
                               rtol=1e-1, atol=1e-1)

    print("KERNEL_OK")
</pallas_src>

<mosaic_0001>
module attributes {stable_mosaic.version = 11 : i64} {
  func.func @_dlnetwork_kernel(%arg0: i32, %arg1: memref<8x30xf32, #tpu.memory_space<vmem>>, %arg2: memref<30x320xbf16, #tpu.memory_space<vmem>>, %arg3: memref<320x160xbf16, #tpu.memory_space<vmem>>, %arg4: memref<160x128xbf16, #tpu.memory_space<vmem>>, %arg5: memref<128x64xbf16, #tpu.memory_space<vmem>>, %arg6: memref<64x32xbf16, #tpu.memory_space<vmem>>, %arg7: memref<32x64xbf16, #tpu.memory_space<vmem>>, %arg8: memref<64x128xbf16, #tpu.memory_space<vmem>>, %arg9: memref<128x2xbf16, #tpu.memory_space<vmem>>, %arg10: memref<1x1408xf32, #tpu.memory_space<vmem>>, %arg11: memref<8x2xf32, #tpu.memory_space<vmem>>) attributes {dimension_semantics = [#tpu.dimension_semantics<parallel>], iteration_bounds = array<i64: 1>, scalar_prefetch = 0 : i64, scratch_operands = 0 : i64, tpu.core_type = #tpu.core_type<tc>, window_params = [{transform_indices = @transform_0, window_bounds = array<i64: 8, 30>}, {pipeline_mode = #tpu.pipeline_mode<synchronous>, transform_indices = @transform_1, window_bounds = array<i64: 30, 320>}, {pipeline_mode = #tpu.pipeline_mode<synchronous>, transform_indices = @transform_2, window_bounds = array<i64: 320, 160>}, {pipeline_mode = #tpu.pipeline_mode<synchronous>, transform_indices = @transform_3, window_bounds = array<i64: 160, 128>}, {pipeline_mode = #tpu.pipeline_mode<synchronous>, transform_indices = @transform_4, window_bounds = array<i64: 128, 64>}, {pipeline_mode = #tpu.pipeline_mode<synchronous>, transform_indices = @transform_5, window_bounds = array<i64: 64, 32>}, {pipeline_mode = #tpu.pipeline_mode<synchronous>, transform_indices = @transform_6, window_bounds = array<i64: 32, 64>}, {pipeline_mode = #tpu.pipeline_mode<synchronous>, transform_indices = @transform_7, window_bounds = array<i64: 64, 128>}, {pipeline_mode = #tpu.pipeline_mode<synchronous>, transform_indices = @transform_8, window_bounds = array<i64: 128, 2>}, {pipeline_mode = #tpu.pipeline_mode<synchronous>, transform_indices = @transform_9, window_bounds = array<i64: 1, 1408>}, {transform_indices = @transform_10, window_bounds = array<i64: 8, 2>}]} {
    %c0 = arith.constant 0 : index
    %c0_0 = arith.constant 0 : index
    %0 = vector.load %arg1[%c0, %c0_0] : memref<8x30xf32, #tpu.memory_space<vmem>>, vector<8x30xf32>
    %1 = arith.truncf %0 : vector<8x30xf32> to vector<8x30xbf16>
    %c0_1 = arith.constant 0 : index
    %c0_2 = arith.constant 0 : index
    %2 = vector.load %arg2[%c0_1, %c0_2] : memref<30x320xbf16, #tpu.memory_space<vmem>>, vector<30x320xbf16>
    %cst = arith.constant dense<0.000000e+00> : vector<8x320xf32>
    %3 = tpu.matmul %1, %2, %cst {dimension_numbers = #tpu.dot_dimension_numbers<[1], [0], [0], [1], [0, 0, 1, 1], [], []>} : vector<8x30xbf16>, vector<30x320xbf16>, vector<8x320xf32> -> vector<8x320xf32>
    %c0_3 = arith.constant 0 : index
    %c0_4 = arith.constant 0 : index
    %4 = vector.load %arg10[%c0_3, %c0_4] : memref<1x1408xf32, #tpu.memory_space<vmem>>, vector<1x320xf32>
    %5 = vector.broadcast %4 : vector<1x320xf32> to vector<8x320xf32>
    %6 = arith.addf %3, %5 : vector<8x320xf32>
    %cst_5 = arith.constant 0.000000e+00 : f32
    %7 = vector.broadcast %cst_5 : f32 to vector<8x320xf32>
    %8 = arith.maximumf %6, %7 : vector<8x320xf32>
    %9 = arith.truncf %8 : vector<8x320xf32> to vector<8x320xbf16>
    %c0_6 = arith.constant 0 : index
    %c0_7 = arith.constant 0 : index
    %10 = vector.load %arg3[%c0_6, %c0_7] : memref<320x160xbf16, #tpu.memory_space<vmem>>, vector<320x160xbf16>
    %cst_8 = arith.constant dense<0.000000e+00> : vector<8x160xf32>
    %11 = tpu.matmul %9, %10, %cst_8 {dimension_numbers = #tpu.dot_dimension_numbers<[1], [0], [0], [1], [0, 0, 1, 1], [], []>} : vector<8x320xbf16>, vector<320x160xbf16>, vector<8x160xf32> -> vector<8x160xf32>
    %c0_9 = arith.constant 0 : index
    %c384 = arith.constant 384 : index
    %12 = vector.load %arg10[%c0_9, %c384] : memref<1x1408xf32, #tpu.memory_space<vmem>>, vector<1x160xf32>
    %13 = vector.broadcast %12 : vector<1x160xf32> to vector<8x160xf32>
    %14 = arith.addf %11, %13 : vector<8x160xf32>
    %15 = arith.truncf %14 : vector<8x160xf32> to vector<8x160xbf16>
    %c0_10 = arith.constant 0 : index
    %c0_11 = arith.constant 0 : index
    %16 = vector.load %arg4[%c0_10, %c0_11] : memref<160x128xbf16, #tpu.memory_space<vmem>>, vector<160x128xbf16>
    %cst_12 = arith.constant dense<0.000000e+00> : vector<8x128xf32>
    %17 = tpu.matmul %15, %16, %cst_12 {dimension_numbers = #tpu.dot_dimension_numbers<[1], [0], [0], [1], [0, 0, 1, 1], [], []>} : vector<8x160xbf16>, vector<160x128xbf16>, vector<8x128xf32> -> vector<8x128xf32>
    %c0_13 = arith.constant 0 : index
    %c640 = arith.constant 640 : index
    %18 = vector.load %arg10[%c0_13, %c640] : memref<1x1408xf32, #tpu.memory_space<vmem>>, vector<1x128xf32>
    %19 = vector.broadcast %18 : vector<1x128xf32> to vector<8x128xf32>
    %20 = arith.addf %17, %19 : vector<8x128xf32>
    %cst_14 = arith.constant 0.000000e+00 : f32
    %21 = vector.broadcast %cst_14 : f32 to vector<8x128xf32>
    %22 = arith.maximumf %20, %21 : vector<8x128xf32>
    %23 = arith.truncf %22 : vector<8x128xf32> to vector<8x128xbf16>
    %c0_15 = arith.constant 0 : index
    %c0_16 = arith.constant 0 : index
    %24 = vector.load %arg5[%c0_15, %c0_16] : memref<128x64xbf16, #tpu.memory_space<vmem>>, vector<128x64xbf16>
    %cst_17 = arith.constant dense<0.000000e+00> : vector<8x64xf32>
    %25 = tpu.matmul %23, %24, %cst_17 {dimension_numbers = #tpu.dot_dimension_numbers<[1], [0], [0], [1], [0, 0, 1, 1], [], []>} : vector<8x128xbf16>, vector<128x64xbf16>, vector<8x64xf32> -> vector<8x64xf32>
    %c0_18 = arith.constant 0 : index
    %c768 = arith.constant 768 : index
    %26 = vector.load %arg10[%c0_18, %c768] : memref<1x1408xf32, #tpu.memory_space<vmem>>, vector<1x64xf32>
    %27 = vector.broadcast %26 : vector<1x64xf32> to vector<8x64xf32>
    %28 = arith.addf %25, %27 : vector<8x64xf32>
    %cst_19 = arith.constant 0.000000e+00 : f32
    %29 = vector.broadcast %cst_19 : f32 to vector<8x64xf32>
    %30 = arith.maximumf %28, %29 : vector<8x64xf32>
    %31 = arith.truncf %30 : vector<8x64xf32> to vector<8x64xbf16>
    %c0_20 = arith.constant 0 : index
    %c0_21 = arith.constant 0 : index
    %32 = vector.load %arg6[%c0_20, %c0_21] : memref<64x32xbf16, #tpu.memory_space<vmem>>, vector<64x32xbf16>
    %cst_22 = arith.constant dense<0.000000e+00> : vector<8x32xf32>
    %33 = tpu.matmul %31, %32, %cst_22 {dimension_numbers = #tpu.dot_dimension_numbers<[1], [0], [0], [1], [0, 0, 1, 1], [], []>} : vector<8x64xbf16>, vector<64x32xbf16>, vector<8x32xf32> -> vector<8x32xf32>
    %c0_23 = arith.constant 0 : index
    %c896 = arith.constant 896 : index
    %34 = vector.load %arg10[%c0_23, %c896] : memref<1x1408xf32, #tpu.memory_space<vmem>>, vector<1x32xf32>
    %35 = vector.broadcast %34 : vector<1x32xf32> to vector<8x32xf32>
    %36 = arith.addf %33, %35 : vector<8x32xf32>
    %37 = arith.truncf %36 : vector<8x32xf32> to vector<8x32xbf16>
    %c0_24 = arith.constant 0 : index
    %c0_25 = arith.constant 0 : index
    %38 = vector.load %arg7[%c0_24, %c0_25] : memref<32x64xbf16, #tpu.memory_space<vmem>>, vector<32x64xbf16>
    %cst_26 = arith.constant dense<0.000000e+00> : vector<8x64xf32>
    %39 = tpu.matmul %37, %38, %cst_26 {dimension_numbers = #tpu.dot_dimension_numbers<[1], [0], [0], [1], [0, 0, 1, 1], [], []>} : vector<8x32xbf16>, vector<32x64xbf16>, vector<8x64xf32> -> vector<8x64xf32>
    %c0_27 = arith.constant 0 : index
    %c1024 = arith.constant 1024 : index
    %40 = vector.load %arg10[%c0_27, %c1024] : memref<1x1408xf32, #tpu.memory_space<vmem>>, vector<1x64xf32>
    %41 = vector.broadcast %40 : vector<1x64xf32> to vector<8x64xf32>
    %42 = arith.addf %39, %41 : vector<8x64xf32>
    %43 = math.tanh %42 : vector<8x64xf32>
    %44 = arith.truncf %43 : vector<8x64xf32> to vector<8x64xbf16>
    %c0_28 = arith.constant 0 : index
    %c0_29 = arith.constant 0 : index
    %45 = vector.load %arg8[%c0_28, %c0_29] : memref<64x128xbf16, #tpu.memory_space<vmem>>, vector<64x128xbf16>
    %cst_30 = arith.constant dense<0.000000e+00> : vector<8x128xf32>
    %46 = tpu.matmul %44, %45, %cst_30 {dimension_numbers = #tpu.dot_dimension_numbers<[1], [0], [0], [1], [0, 0, 1, 1], [], []>} : vector<8x64xbf16>, vector<64x128xbf16>, vector<8x128xf32> -> vector<8x128xf32>
    %c0_31 = arith.constant 0 : index
    %c1152 = arith.constant 1152 : index
    %47 = vector.load %arg10[%c0_31, %c1152] : memref<1x1408xf32, #tpu.memory_space<vmem>>, vector<1x128xf32>
    %48 = vector.broadcast %47 : vector<1x128xf32> to vector<8x128xf32>
    %49 = arith.addf %46, %48 : vector<8x128xf32>
    %50 = math.tanh %49 : vector<8x128xf32>
    %51 = arith.truncf %50 : vector<8x128xf32> to vector<8x128xbf16>
    %c0_32 = arith.constant 0 : index
    %c0_33 = arith.constant 0 : index
    %52 = vector.load %arg9[%c0_32, %c0_33] : memref<128x2xbf16, #tpu.memory_space<vmem>>, vector<128x2xbf16>
    %cst_34 = arith.constant dense<0.000000e+00> : vector<8x2xf32>
    %53 = tpu.matmul %51, %52, %cst_34 {dimension_numbers = #tpu.dot_dimension_numbers<[1], [0], [0], [1], [0, 0, 1, 1], [], []>} : vector<8x128xbf16>, vector<128x2xbf16>, vector<8x2xf32> -> vector<8x2xf32>
    %c0_35 = arith.constant 0 : index
    %c1280 = arith.constant 1280 : index
    %54 = vector.load %arg10[%c0_35, %c1280] : memref<1x1408xf32, #tpu.memory_space<vmem>>, vector<1x2xf32>
    %55 = vector.broadcast %54 : vector<1x2xf32> to vector<8x2xf32>
    %56 = arith.addf %53, %55 : vector<8x2xf32>
    %c0_36 = arith.constant 0 : index
    %c0_37 = arith.constant 0 : index
    %57 = vector.load %arg11[%c0_36, %c0_37] : memref<8x2xf32, #tpu.memory_space<vmem>>, vector<8x2xf32>
    tpu.vector_store %arg11[%c0_36, %c0_37], %56 {strides = array<i32>} : memref<8x2xf32, #tpu.memory_space<vmem>>, vector<8x2xf32>,
    return
  }
  func.func @transform_0(%arg0: i32) -> (i32, i32) {
    %c0_i32 = arith.constant 0 : i32
    %c0_i32_0 = arith.constant 0 : i32
    return %arg0, %c0_i32 : i32, i32
  }
  func.func @transform_1(%arg0: i32) -> (i32, i32) {
    %c0_i32 = arith.constant 0 : i32
    %c0_i32_0 = arith.constant 0 : i32
    %c0_i32_1 = arith.constant 0 : i32
    return %c0_i32, %c0_i32_0 : i32, i32
  }
  func.func @transform_2(%arg0: i32) -> (i32, i32) {
    %c0_i32 = arith.constant 0 : i32
    %c0_i32_0 = arith.constant 0 : i32
    %c0_i32_1 = arith.constant 0 : i32
    return %c0_i32, %c0_i32_0 : i32, i32
  }
  func.func @transform_3(%arg0: i32) -> (i32, i32) {
    %c0_i32 = arith.constant 0 : i32
    %c0_i32_0 = arith.constant 0 : i32
    %c0_i32_1 = arith.constant 0 : i32
    return %c0_i32, %c0_i32_0 : i32, i32
  }
  func.func @transform_4(%arg0: i32) -> (i32, i32) {
    %c0_i32 = arith.constant 0 : i32
    %c0_i32_0 = arith.constant 0 : i32
    %c0_i32_1 = arith.constant 0 : i32
    return %c0_i32, %c0_i32_0 : i32, i32
  }
  func.func @transform_5(%arg0: i32) -> (i32, i32) {
    %c0_i32 = arith.constant 0 : i32
    %c0_i32_0 = arith.constant 0 : i32
    %c0_i32_1 = arith.constant 0 : i32
    return %c0_i32, %c0_i32_0 : i32, i32
  }
  func.func @transform_6(%arg0: i32) -> (i32, i32) {
    %c0_i32 = arith.constant 0 : i32
    %c0_i32_0 = arith.constant 0 : i32
    %c0_i32_1 = arith.constant 0 : i32
    return %c0_i32, %c0_i32_0 : i32, i32
  }
  func.func @transform_7(%arg0: i32) -> (i32, i32) {
    %c0_i32 = arith.constant 0 : i32
    %c0_i32_0 = arith.constant 0 : i32
    %c0_i32_1 = arith.constant 0 : i32
    return %c0_i32, %c0_i32_0 : i32, i32
  }
  func.func @transform_8(%arg0: i32) -> (i32, i32) {
    %c0_i32 = arith.constant 0 : i32
    %c0_i32_0 = arith.constant 0 : i32
    %c0_i32_1 = arith.constant 0 : i32
    return %c0_i32, %c0_i32_0 : i32, i32
  }
  func.func @transform_9(%arg0: i32) -> (i32, i32) {
    %c0_i32 = arith.constant 0 : i32
    %c0_i32_0 = arith.constant 0 : i32
    %c0_i32_1 = arith.constant 0 : i32
    return %c0_i32, %c0_i32_0 : i32, i32
  }
  func.func @transform_10(%arg0: i32) -> (i32, i32) {
    %c0_i32 = arith.constant 0 : i32
    %c0_i32_0 = arith.constant 0 : i32
    return %arg0, %c0_i32 : i32, i32
  }
}

</mosaic_0001>

<bundles_post_ra>
// kernel: dlnetwork_forward.1
= control target key start
LH: loop header
LB: loop body
LE: loop exit
PB: predicated region body
PF: predicated region fallthrough
CT: control target
= control target key end

     0   :  { %v1458_v1 = vmov 0   ;;  %vm96_vm0 = vcmask 1046528   ;;  %vm92_vm1 = vcmask 244736   ;;  %v1459_v9 = vmov 0.0   ;;  %s1854_s1 = inlined_call_operand.vmem [shape: bf16[30,320], index: 1, kind: input, shape index: {}]   ;;  %s1855_s0 = inlined_call_operand.vmem [shape: f32[8,30], index: 0, kind: input, shape index: {}]   ;;  %s1856_s2 = inlined_call_operand.vmem [shape: bf16[320,160], index: 2, kind: input, shape index: {}]   ;;  %s1857_s3 = inlined_call_operand.vmem [shape: bf16[160,128], index: 3, kind: input, shape index: {}]   ;;  %s1858_s9 = inlined_call_operand.vmem [shape: f32[1,1408], index: 9, kind: input, shape index: {}]   ;;  %s1859_s4 = inlined_call_operand.vmem [shape: bf16[128,64], index: 4, kind: input, shape index: {}]   ;;  %s1860_s5 = inlined_call_operand.vmem [shape: bf16[64,32], index: 5, kind: input, shape index: {}]   ;;  %s1861_s6 = inlined_call_operand.vmem [shape: bf16[32,64], index: 6, kind: input, shape index: {}]   ;;  %s1862_s7 = inlined_call_operand.vmem [shape: bf16[64,128], index: 7, kind: input, shape index: {}]   ;;  %s1863_s8 = inlined_call_operand.vmem [shape: bf16[128,2], index: 8, kind: input, shape index: {}]   ;;  %s1864_s10 = inlined_call_operand.vmem [shape: f32[8,2], index: 10, kind: output, shape index: {}]  }
   0x1   :  { %v1350_v0 = vld [vmem:[%s1854_s1 + $0x4] ss:$12 sps:$4 sm:$0xff]   ;;  %138 = vmatprep.mubr.bf16.mxu0 %v1458_v1  ;;  %624 = vmatprep.subr.bf16.mxu1 %v1458_v1  ;;  %v1352_v2 = vld [vmem:[%s1854_s1] ss:$12 sps:$4 sm:$0xff]   ;;  %v1356_v8 = vld [vmem:[%s1854_s1 + $0x8] ss:$12 sps:$4 sm:$0xff]   ;;  %v48_v53 = vlaneseq }
   0x2   :  { %106 = vmatprep.subr.bf16.mxu0 %v1350_v0  ;;  %v1353_v3 = vld [vmem:[%s1854_s1 + $0x1c] ss:$12 sps:$4 sm:$0x7f]   ;;  %v1355_v4 = vld [vmem:[%s1854_s1 + $0x18] ss:$12 sps:$4 sm:$0x7f]  }
   0x3   :  { %107 = vmatpush1.bf16.msra.mxu0 %v1352_v2  ;;  %v36_v5 = vld [vmem:[%s1855_s0] sm:$0xff]  ;;  %v98_v6 = vsel %vm96_vm0, %v1355_v4, 0  ;;  %vm1460_vm2 = vmmov 0   ;;  %v1363_v14 = vld [vmem:[%s1856_s2 + $0x14] ss:$8 sps:$4 sm:$0xff]   ;;  %v1419_v46 = vld [vmem:[%s1857_s3 + $0x8] sm:$0xff]  }
   0x4   :  { %1137 = vmatprep.subr.msk.bf16.mxu0 %vm96_vm0, %v1353_v3  ;;  %v37_v7 = vpack.c.bf16 %v36_v5, %v36_v5  ;;  %v1357_v10 = vld [vmem:[%s1854_s1 + $0x20] ss:$12 sps:$4 sm:$0x7f]   ;;  %v1361_v15 = vld [vmem:[%s1856_s2 + $0x10] ss:$8 sps:$4 sm:$0xff]   ;;  %v49_v54 = vshrl.u32 %v48_v53, 7 }
   0x5   :  { %v104_v11 = vsel %vm96_vm0, %v1357_v10, 0  ;;  %v1360_v12 = vld [vmem:[%s1856_s2 + $0x4] ss:$8 sps:$4 sm:$0xff]   ;;  %v1358_v13 = vld [vmem:[%s1856_s2] ss:$8 sps:$4 sm:$0xff]   ;;  %v1420_v47 = vld [vmem:[%s1857_s3 + $0x10] sm:$0xff]  }
   0x6   :  { %v1366_v16 = vld [vmem:[%s1856_s2 + $0x24] ss:$8 sps:$4 sm:$0xff]   ;;  %v1364_v17 = vld [vmem:[%s1856_s2 + $0x20] ss:$8 sps:$4 sm:$0xff]   ;;  %v1369_v18 = vld [vmem:[%s1856_s2 + $0x34] ss:$8 sps:$4 sm:$0xff]  }
   0x7   :  { %109 = vmatpush1.bf16.msra.mxu0 %v98_v6  ;;  %v1367_v19 = vld [vmem:[%s1856_s2 + $0x30] ss:$8 sps:$4 sm:$0xff]   ;;  %v1372_v20 = vld [vmem:[%s1856_s2 + $0x44] ss:$8 sps:$4 sm:$0xff]   ;;  %v1370_v21 = vld [vmem:[%s1856_s2 + $0x40] ss:$8 sps:$4 sm:$0xff]  }
   0x8   :  { %1261 = vmatprep.subr.bf16.mxu0 %v1459_v9  ;;  %v1375_v22 = vld [vmem:[%s1856_s2 + $0x54] ss:$8 sps:$4 sm:$0xff]   ;;  %v1373_v23 = vld [vmem:[%s1856_s2 + $0x50] ss:$8 sps:$4 sm:$0xff]   ;;  %v1378_v24 = vld [vmem:[%s1856_s2 + $0x64] ss:$8 sps:$4 sm:$0xff]  }
   0x9   :  { %v1376_v25 = vld [vmem:[%s1856_s2 + $0x60] ss:$8 sps:$4 sm:$0xff]   ;;  %v1381_v26 = vld [vmem:[%s1856_s2 + $0x74] ss:$8 sps:$4 sm:$0xff]   ;;  %v1379_v27 = vld [vmem:[%s1856_s2 + $0x70] ss:$8 sps:$4 sm:$0xff]  }
   0xa   :  { %1138 = vmatmul.mubr.msk.bf16.vlgmr.msra.gmra.mrb[0].mxu0 %vm92_vm1, %v37_v7  ;;  %v1384_v28 = vld [vmem:[%s1856_s2 + $0x84] ss:$8 sps:$4 sm:$0xff]   ;;  %v1382_v29 = vld [vmem:[%s1856_s2 + $0x80] ss:$8 sps:$4 sm:$0xff]   ;;  %v1387_v30 = vld [vmem:[%s1856_s2 + $0x94] ss:$8 sps:$4 sm:$0xff]  }
   0xb   :  { %1262 = vmatpush3.bf16.msra.mxu0 %v1356_v8  ;;  %1265 = vmatprep.mubr.msk.bf16.mxu0 %vm1460_vm2, %v1459_v9  ;;  %v1385_v31 = vld [vmem:[%s1856_s2 + $0x90] ss:$8 sps:$4 sm:$0xff]   ;;  %v1390_v32 = vld [vmem:[%s1856_s2 + $0xa4] ss:$8 sps:$4 sm:$0xff]   ;;  %v1388_v33 = vld [vmem:[%s1856_s2 + $0xa0] ss:$8 sps:$4 sm:$0xff]  }
   0xc   :  { %1263 = vmatprep.subr.bf16.mxu0 %v1459_v9  ;;  %v1393_v34 = vld [vmem:[%s1856_s2 + $0xb4] ss:$8 sps:$4 sm:$0xff]   ;;  %v1391_v35 = vld [vmem:[%s1856_s2 + $0xb0] ss:$8 sps:$4 sm:$0xff]   ;;  %v1396_v36 = vld [vmem:[%s1856_s2 + $0xc4] ss:$8 sps:$4 sm:$0xff]  }
   0xd   :  { %v1394_v37 = vld [vmem:[%s1856_s2 + $0xc0] ss:$8 sps:$4 sm:$0xff]   ;;  %v1399_v38 = vld [vmem:[%s1856_s2 + $0xd4] ss:$8 sps:$4 sm:$0xff]   ;;  %v1397_v39 = vld [vmem:[%s1856_s2 + $0xd0] ss:$8 sps:$4 sm:$0xff]  }
   0xe   :  { %v1402_v40 = vld [vmem:[%s1856_s2 + $0xe4] ss:$8 sps:$4 sm:$0xff]   ;;  %v1400_v41 = vld [vmem:[%s1856_s2 + $0xe0] ss:$8 sps:$4 sm:$0xff]   ;;  %v1405_v42 = vld [vmem:[%s1856_s2 + $0xf4] ss:$8 sps:$4 sm:$0xff]  }
   0xf   :  { %1264 = vmatpush3.bf16.msra.mxu0 %v104_v11  ;;  %v1403_v43 = vld [vmem:[%s1856_s2 + $0xf0] ss:$8 sps:$4 sm:$0xff]   ;;  %v1408_v44 = vld [vmem:[%s1856_s2 + $0x104] ss:$8 sps:$4 sm:$0xff]   ;;  %v50_v55 = vsub.s32 0, %v49_v54  ;;  %v54_v57 = vsub.s32 1, %v49_v54 }
  0x10   :  { %449 = vmatprep.subr.bf16.mxu0 %v1360_v12  ;;  %v1418_v45 = vld [vmem:[%s1857_s3] sm:$0xff]   ;;  %v1421_v48 = vld [vmem:[%s1857_s3 + $0x18] sm:$0xff]   ;;  %v1423_v50 = vld [vmem:[%s1857_s3 + $0x28] sm:$0xff]   ;;  %v58_v5 = vsub.s32 2, %v49_v54  ;;  %vm445_vm3 = vcmask 523264   ;;  %vm620_vm4 = vcmask 261120  }
  0x11   :  { %625 = vmatpush1.bf16.msra.mxu1 %v1418_v45  ;;  %v1422_v49 = vld [vmem:[%s1857_s3 + $0x20] sm:$0xff]   ;;  %v1424_v51 = vld [vmem:[%s1857_s3 + $0x30] sm:$0xff]   ;;  %v1425_v52 = vld [vmem:[%s1857_s3 + $0x38] sm:$0xff]   ;;  %vm1125_vm5 = vcmask 15360  }
  0x12   :  { %1266 = vmatmul.mubr.msk.bf16.vlgmr.msra.gmra.mrb[4].mxu0 %vm92_vm1, %v37_v7  ;;  %626 = vmatprep.subr.bf16.mxu1 %v1458_v1  ;;  %v46_v56 = vld [vmem:[%s1858_s9] sm:$0x7]  ;;  %v1411_v10 = vld [vmem:[%s1856_s2 + $0x114] ss:$8 sps:$4 sm:$0xff]   ;;  %v1437_v53 = vld [vmem:[%s1860_s5 + $0x8] sm:$0xff]  }
  0x13   :  { %450 = vmatpush1.bf16.msra.mxu0 %v1358_v13  ;;  %v51_v58 = vrot.slane %v46_v56, %v50_v55  ;;  %v55_v59 = vrot.slane %v46_v56, %v54_v57  ;;  %v1406_v7 = vld [vmem:[%s1856_s2 + $0x100] ss:$8 sps:$4 sm:$0xff]   ;;  %v59_v12 = vrot.slane %v46_v56, %v58_v5  ;;  %v1438_v54 = vld [vmem:[%s1860_s5 + $0x10] sm:$0xff]  }
  0x14   :  { %451 = vmatprep.subr.bf16.mxu0 %v1363_v14  ;;  %v1409_v14 = vld [vmem:[%s1856_s2 + $0x110] ss:$8 sps:$4 sm:$0xff]   ;;  %v1440_v56 = vld [vmem:[%s1861_s6] sm:$0xff]  }
  0x15   :  { %627 = vmatpush1.bf16.msra.mxu1 %v1419_v46 }
  0x16   :  { %628 = vmatprep.subr.bf16.mxu1 %v1458_v1 }
  0x17   :  { %452 = vmatpush1.bf16.msra.mxu0 %v1361_v15 }
  0x18   :  { %453 = vmatprep.subr.bf16.mxu0 %v1366_v16  ;;  %v1414_v16 = vld [vmem:[%s1856_s2 + $0x124] ss:$8 sps:$4 sm:$0xff]  }
  0x19   :  { %629 = vmatpush1.bf16.msra.mxu1 %v1420_v47 }
  0x1a   :  { %630 = vmatprep.subr.bf16.mxu1 %v1458_v1 }
  0x1b   :  { %454 = vmatpush1.bf16.msra.mxu0 %v1364_v17 }
  0x1c   :  { %455 = vmatprep.subr.bf16.mxu0 %v1369_v18 }
  0x1d   :  { %631 = vmatpush1.bf16.msra.mxu1 %v1421_v48 }
  0x1e   :  { %632 = vmatprep.subr.bf16.mxu1 %v1458_v1 }
  0x1f   :  { %456 = vmatpush1.bf16.msra.mxu0 %v1367_v19  ;;  %v1412_v19 = vld [vmem:[%s1856_s2 + $0x120] ss:$8 sps:$4 sm:$0xff]  }
  0x20   :  { %457 = vmatprep.subr.bf16.mxu0 %v1372_v20  ;;  %v1417_v20 = vld [vmem:[%s1856_s2 + $0x134] ss:$8 sps:$4 sm:$0xff]  }
  0x21   :  { %633 = vmatpush1.bf16.msra.mxu1 %v1422_v49 }
  0x22   :  { %634 = vmatprep.subr.bf16.mxu1 %v1458_v1 }
  0x23   :  { %458 = vmatpush1.bf16.msra.mxu0 %v1370_v21 }
  0x24   :  { %459 = vmatprep.subr.bf16.mxu0 %v1375_v22  ;;  %v1415_v22 = vld [vmem:[%s1856_s2 + $0x130] ss:$8 sps:$4 sm:$0xff]  }
  0x25   :  { %635 = vmatpush1.bf16.msra.mxu1 %v1423_v50 }
  0x26   :  { %636 = vmatprep.subr.bf16.mxu1 %v1458_v1 }
  0x27   :  { %460 = vmatpush1.bf16.msra.mxu0 %v1373_v23 }
  0x28   :  { %461 = vmatprep.subr.bf16.mxu0 %v1378_v24  ;;  %v1426_v24 = vld [vmem:[%s1857_s3 + $0x40] sm:$0xff]  }
  0x29   :  { %637 = vmatpush1.bf16.msra.mxu1 %v1424_v51  ;;  %v1436_v51 = vld [vmem:[%s1860_s5] sm:$0xff]  }
  0x2a   :  { %638 = vmatprep.subr.bf16.mxu1 %v1458_v1 }
  0x2b   :  { %462 = vmatpush1.bf16.msra.mxu0 %v1376_v25  ;;  %v1427_v25 = vld [vmem:[%s1857_s3 + $0x48] sm:$0xff]  }
  0x2c   :  { %463 = vmatprep.subr.bf16.mxu0 %v1381_v26  ;;  %v233_v26 = vld [vmem:[%s1858_s9 + $0x3] sm:$0x3] }
  0x2d   :  { %639 = vmatpush1.bf16.msra.mxu1 %v1425_v52 }
  0x2e   :  { %640 = vmatprep.subr.bf16.mxu1 %v1458_v1 }
  0x2f   :  { %464 = vmatpush1.bf16.msra.mxu0 %v1379_v27  ;;  %v238_v27 = vrot.slane %v233_v26, %v50_v55  ;;  %v1439_v55 = vld [vmem:[%s1860_s5 + $0x18] sm:$0xff]  }
  0x30   :  { %465 = vmatprep.subr.bf16.mxu0 %v1384_v28  ;;  %v242_v28 = vrot.slane %v233_v26, %v54_v57  ;;  %v1193_v57 = vld [vmem:[%s1858_s9 + $0x6] ss:$0 sm:$0xff] }
  0x31   :  { %641 = vmatpush1.bf16.msra.mxu1 %v1426_v24 }
  0x32   :  { %642 = vmatprep.subr.bf16.mxu1 %v1458_v1 }
  0x33   :  { %466 = vmatpush1.bf16.msra.mxu0 %v1382_v29 }
  0x34   :  { %467 = vmatprep.subr.bf16.mxu0 %v1387_v30 }
  0x35   :  { %643 = vmatpush1.bf16.msra.mxu1 %v1427_v25 }
  0x36   :  { %1269 = vmatprep.subr.bf16.mxu1 %v1459_v9 }
  0x37   :  { %468 = vmatpush1.bf16.msra.mxu0 %v1385_v31 }
  0x38   :  { %469 = vmatprep.subr.bf16.mxu0 %v1390_v32 }
  0x3b   :  { %470 = vmatpush1.bf16.msra.mxu0 %v1388_v33 }
  0x3c   :  { %471 = vmatprep.subr.bf16.mxu0 %v1393_v34 }
  0x3f   :  { %472 = vmatpush1.bf16.msra.mxu0 %v1391_v35  ;;  %v1428_v35 = vld [vmem:[%s1859_s4] sm:$0xff]  }
  0x40   :  { %473 = vmatprep.subr.bf16.mxu0 %v1396_v36 }
  0x43   :  { %474 = vmatpush1.bf16.msra.mxu0 %v1394_v37  ;;  %v1429_v37 = vld [vmem:[%s1859_s4 + $0x8] sm:$0xff]  }
  0x44   :  { %475 = vmatprep.subr.bf16.mxu0 %v1399_v38  ;;  %v1430_v38 = vld [vmem:[%s1859_s4 + $0x10] sm:$0xff]  }
  0x47   :  { %476 = vmatpush1.bf16.msra.mxu0 %v1397_v39  ;;  %v1431_v39 = vld [vmem:[%s1859_s4 + $0x18] sm:$0xff]  }
  0x48   :  { %477 = vmatprep.subr.bf16.mxu0 %v1402_v40  ;;  %v1432_v40 = vld [vmem:[%s1859_s4 + $0x20] sm:$0xff]  }
  0x4b   :  { %478 = vmatpush1.bf16.msra.mxu0 %v1400_v41  ;;  %v1433_v41 = vld [vmem:[%s1859_s4 + $0x28] sm:$0xff]  }
  0x4c   :  { %479 = vmatprep.subr.bf16.mxu0 %v1405_v42  ;;  %v1434_v42 = vld [vmem:[%s1859_s4 + $0x30] sm:$0xff]  }
  0x4f   :  { %480 = vmatpush1.bf16.msra.mxu0 %v1403_v43  ;;  %v1435_v43 = vld [vmem:[%s1859_s4 + $0x38] sm:$0xff]  }
  0x50   :  { %490 = vmatprep.subr.bf16.mxu0 %v1408_v44  ;;  %v1181_v44 = vld [vmem:[%s1858_s9 + $0x5] ss:$0 sm:$0xff] }
  0xdd   :  { %v140_v60 = vpop.f32.mrb[0].mxu0 }
  0xde   :  { %v141_v61 = vadd.f32 %v140_v60, %v51_v58  ;;  %v142_v62 = vpop.f32.mrb[1].mxu0 }
  0xdf   :  { %v143_v63 = vadd.f32 %v142_v62, %v55_v59  ;;  %v144_v0 = vpop.f32.mrb[2].mxu0 }
  0xe0   :  { %v187_v2 = vmax.f32 %v141_v61, 0.0  ;;  %v145_v3 = vpop.f32.mrb[3].mxu0 }
  0xe1   :  { %v188_v4 = vmax.f32 %v143_v63, 0.0  ;;  %v1202_v3 = vld [vmem:[%s1858_s9 + $0x7] ss:$0 sm:$0xff] }
  0xe2   :  { %v190_v8 = vpack.c.bf16 %v187_v2, %v187_v2  ;;  %v1441_v2 = vld [vmem:[%s1861_s6 + $0x8] sm:$0xff]  }
  0xe3   :  { %v191_v6 = vpack.c.bf16 %v188_v4, %v188_v4 }
  0xe5   :  { %481 = vmatprep.mubr.bf16.mxu0 %v191_v6  ;;  %v181_v11 = vpop.f32.mrb[4].mxu0 }
  0xe6   :  { %482 = vmatmul.mubr.bf16.vlgmr.msra.gmra.mrb[8].mxu0 %v190_v8  ;;  %v1267_v13 = vpop.f32.mrb[5].mxu0  ;;  %v182_v18 = vadd.f32 %v181_v11, %v59_v12  ;;  %v1442_v11 = vld [vmem:[%s1862_s7] sm:$0xff]   ;;  %v1443_v12 = vld [vmem:[%s1862_s7 + $0x8] sm:$0xff]  }
  0xe7   :  { %491 = vmatpush1.bf16.msra.mxu0 %v1406_v7  ;;  %v184_v15 = vpop.f32.mrb[6].mxu0  ;;  %522 = vmatprep.mubr.bf16.mxu0 %v1458_v1  ;;  %v1444_v13 = vld [vmem:[%s1862_s7 + $0x10] sm:$0xff]  }
  0xe8   :  { %492 = vmatprep.subr.bf16.mxu0 %v1411_v10  ;;  %v1268_v17 = vpop.f32.mrb[7].mxu0  ;;  %v189_v21 = vmax.f32 %v182_v18, 0.0  ;;  %v1446_v15 = vld [vmem:[%s1863_s8] sm:$0xff]   ;;  %v1449_v18 = vld [vmem:[%s1863_s8 + $0x18] sm:$0xff]  }
  0xe9   :  { %v1448_v17 = vld [vmem:[%s1863_s8 + $0x10] sm:$0xff]  }
  0xea   :  { %v192_v23 = vpack.c.bf16 %v189_v21, %v189_v21 }
  0xeb   :  { %493 = vmatpush1.bf16.msra.mxu0 %v1409_v14  ;;  %v1445_v14 = vld [vmem:[%s1862_s7 + $0x18] sm:$0xff]  }
  0xec   :  { %494 = vmatprep.subr.bf16.mxu0 %v1414_v16  ;;  %v1447_v16 = vld [vmem:[%s1863_s8 + $0x8] sm:$0xff]  }
  0xef   :  { %495 = vmatpush1.bf16.msra.mxu0 %v1412_v19  ;;  %v1208_v19 = vld [vmem:[%s1858_s9 + $0x8] ss:$0 sm:$0xff] }
  0xf0   :  { %496 = vmatprep.subr.bf16.mxu0 %v1417_v20 }
  0xf3   :  { %497 = vmatpush1.bf16.msra.mxu0 %v1415_v22 }
  0xf4   :  { %1301 = vmatprep.subr.bf16.mxu0 %v1459_v9 }
  0xf6   :  { %1180 = vmatmul.mubr.msk.bf16.vlgmr.msra.gmra.mrb[8].mxu0 %vm445_vm3, %v192_v23 }
  0xf7   :  { %1305 = vmatprep.mubr.msk.bf16.mxu0 %vm1460_vm2, %v1459_v9  ;;  %1302 = vmatpush3.bf16.msra.mxu0 %v1440_v56 }
  0xf8   :  { %1303 = vmatprep.subr.bf16.mxu0 %v1459_v9 }
  0xfb   :  { %1304 = vmatpush3.bf16.msra.mxu0 %v1441_v2 }
  0xfc   :  { %1309 = vmatprep.subr.bf16.mxu0 %v1459_v9 }
 0x1c9   :  { %v524_v29 = vpop.f32.mrb[8].mxu0 }
 0x1ca   :  { %v1341_v30 = vadd.f32 %v524_v29, %v238_v27  ;;  %v526_v31 = vpop.f32.mrb[9].mxu0  ;;  %v1450_v27 = vld [vmem:[%s1863_s8 + $0x20] sm:$0xff]   ;;  %v1452_v29 = vld [vmem:[%s1863_s8 + $0x30] sm:$0xff]  }
 0x1cb   :  { %v1342_v32 = vadd.f32 %v526_v31, %v242_v28  ;;  %v528_v33 = vpop.f32.mrb[10].mxu0  ;;  %v1451_v28 = vld [vmem:[%s1863_s8 + $0x28] sm:$0xff]  }
 0x1cc   :  { %v529_v34 = vpop.f32.mrb[11].mxu0  ;;  %v531_v36 = vpack.c.bf16 %v1341_v30, %v1341_v30  ;;  %v1453_v30 = vld [vmem:[%s1863_s8 + $0x38] sm:$0xff]   ;;  %v1212_v31 = vld [vmem:[%s1858_s9 + $0x9] ss:$0 sm:$0xff] }
 0x1cd   :  { %v532_v1 = vpack.c.bf16 %v1342_v32, %v1342_v32 }
 0x1cf   :  { %1192 = vmatprep.mubr.msk.bf16.mxu1 %vm620_vm4, %v532_v1 }
 0x1d0   :  { %657 = vmatmul.mubr.bf16.vlgmr.msra.gmra.mrb[0].mxu1 %v531_v36 }
 0x1d1   :  { %1270 = vmatpush3.bf16.msra.mxu1 %v1428_v35  ;;  %1285 = vmatprep.mubr.msk.bf16.mxu1 %vm1460_vm2, %v1459_v9 }
 0x1d2   :  { %1271 = vmatprep.subr.bf16.mxu1 %v1459_v9 }
 0x1d5   :  { %1272 = vmatpush3.bf16.msra.mxu1 %v1429_v37 }
 0x1d6   :  { %1273 = vmatprep.subr.bf16.mxu1 %v1459_v9 }
 0x1d9   :  { %1274 = vmatpush3.bf16.msra.mxu1 %v1430_v38 }
 0x1da   :  { %1275 = vmatprep.subr.bf16.mxu1 %v1459_v9 }
 0x1dd   :  { %1276 = vmatpush3.bf16.msra.mxu1 %v1431_v39 }
 0x1de   :  { %1277 = vmatprep.subr.bf16.mxu1 %v1459_v9 }
 0x1e1   :  { %1278 = vmatpush3.bf16.msra.mxu1 %v1432_v40 }
 0x1e2   :  { %1279 = vmatprep.subr.bf16.mxu1 %v1459_v9 }
 0x1e5   :  { %1280 = vmatpush3.bf16.msra.mxu1 %v1433_v41 }
 0x1e6   :  { %1281 = vmatprep.subr.bf16.mxu1 %v1459_v9 }
 0x1e9   :  { %1282 = vmatpush3.bf16.msra.mxu1 %v1434_v42 }
 0x1ea   :  { %1283 = vmatprep.subr.bf16.mxu1 %v1459_v9 }
 0x1ed   :  { %1284 = vmatpush3.bf16.msra.mxu1 %v1435_v43 }
 0x1ee   :  { %1289 = vmatprep.subr.bf16.mxu1 %v1459_v9 }
 0x2a3   :  { %v658_v45 = vpop.f32.mrb[0].mxu1 }
 0x2a4   :  { %v659_v46 = vadd.f32 %v1181_v44, %v658_v45  ;;  %v660_v47 = vpop.f32.mrb[1].mxu1 }
 0x2a5   :  { %v661_v48 = vpop.f32.mrb[2].mxu1 }
 0x2a6   :  { %v664_v49 = vmax.f32 %v659_v46, 0.0  ;;  %v662_v50 = vpop.f32.mrb[3].mxu1 }
 0x2a8   :  { %v665_v52 = vpack.c.bf16 %v664_v49, %v664_v49 }
 0x2aa   :  { %1286 = vmatmul.mubr.bf16.vlgmr.msra.gmra.mrb[4].mxu1 %v665_v52 }
 0x2ab   :  { %1290 = vmatpush3.bf16.msra.mxu1 %v1436_v51  ;;  %1297 = vmatprep.mubr.msk.bf16.mxu1 %vm1460_vm2, %v1459_v9 }
 0x2ac   :  { %1291 = vmatprep.subr.bf16.mxu1 %v1459_v9 }
 0x2af   :  { %1292 = vmatpush3.bf16.msra.mxu1 %v1437_v53 }
 0x2b0   :  { %1293 = vmatprep.subr.bf16.mxu1 %v1459_v9 }
 0x2b3   :  { %1294 = vmatpush3.bf16.msra.mxu1 %v1438_v54 }
 0x2b4   :  { %1295 = vmatprep.subr.bf16.mxu1 %v1459_v9 }
 0x2b7   :  { %1296 = vmatpush3.bf16.msra.mxu1 %v1439_v55 }
 0x2b8   :  { %1321 = vmatprep.subr.bf16.mxu1 %v1459_v9 }
 0x37d   :  { %v771_v58 = vpop.f32.mrb[4].mxu1 }
 0x37e   :  { %v772_v59 = vadd.f32 %v1193_v57, %v771_v58  ;;  %v1287_v60 = vpop.f32.mrb[5].mxu1 }
 0x37f   :  { %v774_v61 = vpop.f32.mrb[6].mxu1 }
 0x380   :  { %v777_v62 = vmax.f32 %v772_v59, 0.0  ;;  %v1288_v63 = vpop.f32.mrb[7].mxu1 }
 0x382   :  { %v778_v0 = vpack.c.bf16 %v777_v62, %v777_v62 }
 0x384   :  { %1298 = vmatmul.mubr.msk.bf16.vlgmr.msra.gmra.mrb[8].mxu1 %vm445_vm3, %v778_v0 }
 0x385   :  { %1337 = vmatprep.mubr.msk.bf16.mxu1 %vm1460_vm2, %v1459_v9  ;;  %1322 = vmatpush3.bf16.msra.mxu1 %v1446_v15 }
 0x386   :  { %1323 = vmatprep.subr.bf16.mxu1 %v1459_v9 }
 0x389   :  { %1324 = vmatpush3.bf16.msra.mxu1 %v1447_v16 }
 0x38a   :  { %1325 = vmatprep.subr.bf16.mxu1 %v1459_v9 }
 0x38d   :  { %1326 = vmatpush3.bf16.msra.mxu1 %v1448_v17 }
 0x38e   :  { %1327 = vmatprep.subr.bf16.mxu1 %v1459_v9 }
 0x391   :  { %1328 = vmatpush3.bf16.msra.mxu1 %v1449_v18 }
 0x392   :  { %1329 = vmatprep.subr.bf16.mxu1 %v1459_v9 }
 0x395   :  { %1330 = vmatpush3.bf16.msra.mxu1 %v1450_v27 }
 0x396   :  { %1331 = vmatprep.subr.bf16.mxu1 %v1459_v9 }
 0x399   :  { %1332 = vmatpush3.bf16.msra.mxu1 %v1451_v28 }
 0x39a   :  { %1333 = vmatprep.subr.bf16.mxu1 %v1459_v9 }
 0x39d   :  { %1334 = vmatpush3.bf16.msra.mxu1 %v1452_v29 }
 0x39e   :  { %1335 = vmatprep.subr.bf16.mxu1 %v1459_v9 }
 0x3a1   :  { %1336 = vmatpush3.bf16.msra.mxu1 %v1453_v30 }
 0x457   :  { %v855_v4 = vpop.f32.mrb[8].mxu1 }
 0x458   :  { %v856_v5 = vadd.f32 %v1202_v3, %v855_v4  ;;  %v1299_v6 = vpop.f32.mrb[9].mxu1 }
 0x459   :  { %v858_v7 = vpop.f32.mrb[10].mxu1 }
 0x45a   :  { %v861_v8 = vpack.c.bf16 %v856_v5, %v856_v5  ;;  %v1300_v10 = vpop.f32.mrb[11].mxu1 }
 0x45c   :  { %1306 = vmatmul.mubr.msk.bf16.vlgmr.msra.gmra.mrb[12].mxu0 %vm620_vm4, %v861_v8 }
 0x45d   :  { %1317 = vmatprep.mubr.msk.bf16.mxu0 %vm1460_vm2, %v1459_v9  ;;  %1310 = vmatpush3.bf16.msra.mxu0 %v1442_v11 }
 0x45e   :  { %1311 = vmatprep.subr.bf16.mxu0 %v1459_v9 }
 0x461   :  { %1312 = vmatpush3.bf16.msra.mxu0 %v1443_v12 }
 0x462   :  { %1313 = vmatprep.subr.bf16.mxu0 %v1459_v9 }
 0x465   :  { %1314 = vmatpush3.bf16.msra.mxu0 %v1444_v13 }
 0x466   :  { %1315 = vmatprep.subr.bf16.mxu0 %v1459_v9  ;;  %v1218_v9 = vld [vmem:[%s1858_s9 + $0xa] ss:$0 sm:$0xff] }
 0x469   :  { %1316 = vmatpush3.bf16.msra.mxu0 %v1445_v14 }
 0x52f   :  { %v922_v20 = vpop.f32.mrb[12].mxu0 }
 0x530   :  { %v923_v21 = vadd.f32 %v1208_v19, %v922_v20  ;;  %v1307_v22 = vpop.f32.mrb[13].mxu0 }
 0x531   :  { %v925_v23 = vpop.f32.mrb[14].mxu0 }
 0x532   :  { %1454 = vtanh.f32 %v923_v21  ;;  %v1308_v24 = vpop.f32.mrb[15].mxu0 }
 0x53c   :  { %v1455_v25 = vpop.eup %1454 }
 0x53d   :  { %v929_v26 = vpack.c.bf16 %v1455_v25, %v1455_v25 }
 0x53f   :  { %1318 = vmatmul.mubr.msk.bf16.vlgmr.msra.gmra.mrb[16].mxu0 %vm445_vm3, %v929_v26 }
 0x612   :  { %v1006_v32 = vpop.f32.mrb[16].mxu0 }
 0x613   :  { %v1007_v33 = vadd.f32 %v1212_v31, %v1006_v32  ;;  %v1319_v34 = vpop.f32.mrb[17].mxu0 }
 0x614   :  { %v1009_v1 = vpop.f32.mrb[18].mxu0 }
 0x615   :  { %1456 = vtanh.f32 %v1007_v33  ;;  %v1320_v35 = vpop.f32.mrb[19].mxu0 }
 0x61f   :  { %v1457_v36 = vpop.eup %1456 }
 0x620   :  { %v1013_v37 = vpack.c.bf16 %v1457_v36, %v1457_v36 }
 0x622   :  { %1338 = vmatmul.mubr.bf16.vlgmr.msra.gmra.mrb[12].mxu1 %v1013_v37 }
 0x6f5   :  { %v1119_v38 = vpop.f32.mrb[12].mxu1 }
 0x6f6   :  { %v1120_v39 = vadd.f32 %v1218_v9, %v1119_v38  ;;  %v1339_v40 = vpop.f32.mrb[13].mxu1 }
 0x6f7   :  { %v1122_v41 = vpop.f32.mrb[14].mxu1 }
 0x6f8   :  { %1126 = vst.msk [vmem:[%s1864_s10] sm:$0xff] %vm1125_vm5, %v1120_v39  ;;  %v1340_v42 = vpop.f32.mrb[15].mxu1 }

</bundles_post_ra>
